<compile_context>
chip_gen: v5e
topology: v5e:2x2
jax: 0.10.0
libtpu: 0.0.40
codegen_flags: <defaults>
</compile_context>

<pallas_src>
import jax
import jax.numpy as jnp
import numpy as np
from jax.experimental import pallas as pl
from jax.experimental.pallas import tpu as pltpu

EPS = 1e-5
NEG_SLOPE = 0.2


def _round_up(x, m):
    return ((x + m - 1) // m) * m


def _leaky(x):
    return jnp.where(x > 0, x, NEG_SLOPE * x)


def _instance_norm_lanes(h):
    # h: (C, L) f32; InstanceNorm1d (biased variance, no affine, eps=1e-5)
    # normalizing over time = the lane axis (cross-lane reduce -> XLU slot).
    mean = jnp.mean(h, axis=1, keepdims=True)
    var = jnp.mean((h - mean) ** 2, axis=1, keepdims=True)
    return (h - mean) * jax.lax.rsqrt(var + EPS)


def residual_up_block_kernel(up_ref, skip_ref, w1_ref, b1_ref, w2_ref, b2_ref,
                             wr_ref, br_ref, out_ref,
                             cpad_ref, stack1_ref, hpad_ref, stack2_ref):
    # up_ref, skip_ref : (C_in, L)          current batch element, NCL layout
    # w1_ref           : (C_mid, K*2*C_in)  conv1 weight, im2col layout
    # w2_ref           : (C_out, K*C_mid)   conv2 weight, im2col layout
    # wr_ref           : (C_out, 2*C_in)    residual 1x1 conv weight
    # b*_ref           : (C, 1) f32 biases
    # out_ref          : (C_out, L)         lane-dense output (L on lanes)
    # cpad_ref  : (2*C_in, LEFT+L+PAD) scratch — time-padded concat
    # stack1_ref: (K*2*C_in, L)        scratch — im2col stack for conv1
    # hpad_ref  : (C_mid,  LEFT+L+PAD) scratch — time-padded conv1 activation
    # stack2_ref: (K*C_mid, L)         scratch — im2col stack for conv2
    C_out, L = out_ref.shape
    C_in = up_ref.shape[0]
    C2 = 2 * C_in
    C_mid = w1_ref.shape[0]
    K = w1_ref.shape[1] // C2
    PAD = (K - 1) // 2
    LEFT = cpad_ref.shape[1] - L - PAD      # 128-aligned interior lane offset
    cdt = cpad_ref.dtype                    # matmul compute dtype (f32/bf16)

    # ---- assemble time-padded concat in VMEM: zero only the PAD fringes ----
    if PAD > 0:
        cpad_ref[:, LEFT - PAD:LEFT] = jnp.zeros((C2, PAD), cdt)
        cpad_ref[:, LEFT + L:LEFT + L + PAD] = jnp.zeros((C2, PAD), cdt)
    cpad_ref[0:C_in, LEFT:LEFT + L] = up_ref[...].astype(cdt)
    cpad_ref[C_in:C2, LEFT:LEFT + L] = skip_ref[...].astype(cdt)

    # ---- conv1 (k=K, pad=PAD) as ONE MXU matmul over the im2col stack ----
    for k in range(K):                      # K static tap copies (lane shift)
        stack1_ref[k * C2:(k + 1) * C2, :] = (
            cpad_ref[:, LEFT - PAD + k:LEFT - PAD + k + L])
    h = jnp.dot(w1_ref[...], stack1_ref[...],
                preferred_element_type=jnp.float32) + b1_ref[...]

    # ---- InstanceNorm1d + LeakyReLU(0.2) in f32 ----
    h = _leaky(_instance_norm_lanes(h))

    # ---- conv2: same single-matmul scheme ----
    if PAD > 0:
        hpad_ref[:, LEFT - PAD:LEFT] = jnp.zeros((C_mid, PAD), cdt)
        hpad_ref[:, LEFT + L:LEFT + L + PAD] = jnp.zeros((C_mid, PAD), cdt)
    hpad_ref[:, LEFT:LEFT + L] = h.astype(cdt)
    for k in range(K):
        stack2_ref[k * C_mid:(k + 1) * C_mid, :] = (
            hpad_ref[:, LEFT - PAD + k:LEFT - PAD + k + L])
    h2 = jnp.dot(w2_ref[...], stack2_ref[...],
                 preferred_element_type=jnp.float32) + b2_ref[...]
    h2 = _instance_norm_lanes(h2)

    # ---- residual 1x1 conv last (bounds its live range); aligned read ----
    residual = jnp.dot(wr_ref[...], cpad_ref[:, LEFT:LEFT + L],
                       preferred_element_type=jnp.float32) + br_ref[...]

    out_ref[...] = _leaky(h2 + residual).astype(out_ref.dtype)


def upsample_linear_2x(x):
    # x: (B, C, T) -> (B, C, 2T); PyTorch Upsample(mode='linear',
    # align_corners=False) semantics.  Cheap glue on the small pre-upsample
    # tensor; everything downstream of the concat runs inside the kernel.
    B, C, T = x.shape
    j = jnp.arange(2 * T, dtype=jnp.float32)
    src = jnp.maximum(j * 0.5 - 0.25, 0.0)
    i0 = jnp.clip(jnp.floor(src).astype(jnp.int32), 0, T - 1)
    i1 = jnp.clip(i0 + 1, 0, T - 1)
    w1 = src - i0.astype(jnp.float32)
    w0 = 1.0 - w1
    return x[:, :, i0] * w0[None, None, :] + x[:, :, i1] * w1[None, None, :]


def prepare_params(w1, b1, w2, b2, wr, br, compute_dtype=jnp.float32):
    """One-time re-layout of PyTorch Conv1d params (O, I, K) into the kernel's
    im2col layout.  Hoisted out of the per-call path (call once at load)."""
    C_mid, C2, K = w1.shape
    C_out = w2.shape[0]
    # W2d[o, k*I + i] = w[o, i, k]  (matches stack row ordering [k][i])
    w1_2d = jnp.transpose(w1, (0, 2, 1)).reshape(C_mid, K * C2)
    w2_2d = jnp.transpose(w2, (0, 2, 1)).reshape(C_out, K * w2.shape[1])
    wr_2d = wr[:, :, 0]
    return dict(
        w1=w1_2d.astype(compute_dtype),
        b1=b1.reshape(C_mid, 1).astype(jnp.float32),
        w2=w2_2d.astype(compute_dtype),
        b2=b2.reshape(C_out, 1).astype(jnp.float32),
        wr=wr_2d.astype(compute_dtype),
        br=br.reshape(C_out, 1).astype(jnp.float32),
    )


def _vmem_tile_bytes(shape, dtype):
    r, c = shape[-2], shape[-1]
    return _round_up(r, 8) * _round_up(c, 128) * jnp.dtype(dtype).itemsize


def residual_up_block(x, skip, params):
    """x: (B, C_in, T), skip: (B, C_in, L), params from prepare_params().
    Returns (B, C_out, L) in the module's native NCL layout (no transposes)."""
    B, C_in, _ = x.shape
    L = skip.shape[2]
    C2 = 2 * C_in
    C_mid = params["w1"].shape[0]
    C_out = params["w2"].shape[0]
    K = params["w1"].shape[1] // C2
    PAD = K // 2
    LEFT = _round_up(PAD, 128)            # interior starts on a lane boundary
    Lp = LEFT + L + PAD
    cdt = params["w1"].dtype

    # Upsample (fuses with the cast under jit -> `up` lands in HBM already in
    # the matmul compute dtype); fit to skip length like the PyTorch module.
    up = upsample_linear_2x(x).astype(cdt)
    if up.shape[2] < L:
        up = jnp.pad(up, ((0, 0), (0, 0), (0, L - up.shape[2])))
    elif up.shape[2] > L:
        up = up[:, :, :L]

    # Explicit VMEM budget (review: verify the block fits, esp. v7x 64 MiB).
    est = 0
    for shp, dt in [((C_in, L), up.dtype), ((C_in, L), skip.dtype),
                    ((C_mid, K * C2), cdt), ((C_mid, 1), jnp.float32),
                    ((C_out, K * C_mid), cdt), ((C_out, 1), jnp.float32),
                    ((C_out, C2), cdt), ((C_out, 1), jnp.float32),
                    ((C_out, L), jnp.float32)]:
        est += 2 * _vmem_tile_bytes(shp, dt)          # double-buffered
    for shp in [(C2, Lp), (K * C2, L), (C_mid, Lp), (K * C_mid, L)]:
        est += _vmem_tile_bytes(shp, cdt)             # scratch
    vmem_limit = int(min(64 * 2**20, max(16 * 2**20, 2 * est)))

    out = pl.pallas_call(
        residual_up_block_kernel,
        out_shape=jax.ShapeDtypeStruct((B, C_out, L), jnp.float32),
        grid_spec=pltpu.PrefetchScalarGridSpec(
            num_scalar_prefetch=0,
            grid=(B,),
            in_specs=[
                pl.BlockSpec((None, C_in, L), lambda b: (b, 0, 0)),    # up
                pl.BlockSpec((None, C_in, L), lambda b: (b, 0, 0)),    # skip
                pl.BlockSpec((C_mid, K * C2), lambda b: (0, 0)),       # w1
                pl.BlockSpec((C_mid, 1), lambda b: (0, 0)),            # b1
                pl.BlockSpec((C_out, K * C_mid), lambda b: (0, 0)),    # w2
                pl.BlockSpec((C_out, 1), lambda b: (0, 0)),            # b2
                pl.BlockSpec((C_out, C2), lambda b: (0, 0)),           # wr
                pl.BlockSpec((C_out, 1), lambda b: (0, 0)),            # br
            ],
            out_specs=pl.BlockSpec((None, C_out, L), lambda b: (b, 0, 0)),
            scratch_shapes=[
                pltpu.VMEM((C2, Lp), cdt),           # cpad
                pltpu.VMEM((K * C2, L), cdt),        # stack1
                pltpu.VMEM((C_mid, Lp), cdt),        # hpad
                pltpu.VMEM((K * C_mid, L), cdt),     # stack2
            ],
        ),
        compiler_params=pltpu.CompilerParams(
            dimension_semantics=("parallel",),
            vmem_limit_bytes=vmem_limit),
    )(up, skip, params["w1"], params["b1"], params["w2"], params["b2"],
      params["wr"], params["br"])
    return out


# ---------------- pure-JAX reference (mirrors the PyTorch module) -----------
def reference(x, skip, w1, b1, w2, b2, wr, br):
    up = upsample_linear_2x(x)
    L = skip.shape[2]
    if up.shape[2] < L:
        up = jnp.pad(up, ((0, 0), (0, 0), (0, L - up.shape[2])))
    elif up.shape[2] > L:
        up = up[:, :, :L]
    concat = jnp.concatenate([up, skip], axis=1)

    def conv1d(x_, w_, b_, pad):
        out = jax.lax.conv_general_dilated(
            x_, w_, window_strides=(1,), padding=[(pad, pad)],
            dimension_numbers=("NCH", "OIH", "NCH"))
        return out + b_[None, :, None]

    def inorm(h):
        m = jnp.mean(h, axis=2, keepdims=True)
        v = jnp.mean((h - m) ** 2, axis=2, keepdims=True)
        return (h - m) / jnp.sqrt(v + EPS)

    residual = conv1d(concat, wr, br, 0)
    h = conv1d(concat, w1, b1, w1.shape[2] // 2)
    h = _leaky(inorm(h))
    h = conv1d(h, w2, b2, w2.shape[2] // 2)
    h = inorm(h)
    return _leaky(h + residual)


if __name__ == "__main__":
    B, C_in, C_out, T, K = 2, 4, 8, 8, 5
    key = jax.random.PRNGKey(0)
    ks = jax.random.split(key, 8)

    x = jax.random.normal(ks[0], (B, C_in, T), jnp.float32)
    skip = jax.random.normal(ks[1], (B, C_in, 2 * T), jnp.float32)

    # Deterministic synthetic parameters (PyTorch Conv1d weight layout O,I,K)
    w1 = 0.1 * jax.random.normal(ks[2], (C_in, 2 * C_in, K), jnp.float32)
    b1 = 0.1 * jax.random.normal(ks[3], (C_in,), jnp.float32)
    w2 = 0.1 * jax.random.normal(ks[4], (C_out, C_in, K), jnp.float32)
    b2 = 0.1 * jax.random.normal(ks[5], (C_out,), jnp.float32)
    wr = 0.1 * jax.random.normal(ks[6], (C_out, 2 * C_in, 1), jnp.float32)
    br = 0.1 * jax.random.normal(ks[7], (C_out,), jnp.float32)

    ref = reference(x, skip, w1, b1, w2, b2, wr, br)

    # f32 matmul path: strict correctness check against pure-JAX reference.
    params_f32 = prepare_params(w1, b1, w2, b2, wr, br, jnp.float32)
    out_f32 = jax.block_until_ready(
        jax.jit(residual_up_block)(x, skip, params_f32))
    np.testing.assert_allclose(np.asarray(out_f32), np.asarray(ref),
                               rtol=1e-4, atol=1e-4)

    # bf16 matmul path (MXU-native on v5e/v6e/v7x, f32 accumulation):
    # smoke-check with tolerance appropriate for bf16 operand rounding.
    params_bf16 = prepare_params(w1, b1, w2, b2, wr, br, jnp.bfloat16)
    out_bf16 = jax.block_until_ready(
        jax.jit(residual_up_block)(x, skip, params_bf16))
    np.testing.assert_allclose(np.asarray(out_bf16), np.asarray(ref),
                               rtol=1e-1, atol=1e-1)

    print("KERNEL_OK")
</pallas_src>

<mosaic_0001>
module attributes {stable_mosaic.version = 11 : i64} {
  func.func @residual_up_block_kernel(%arg0: i32, %arg1: memref<1x4x16xf32, #tpu.memory_space<vmem>>, %arg2: memref<1x4x16xf32, #tpu.memory_space<vmem>>, %arg3: memref<4x40xf32, #tpu.memory_space<vmem>>, %arg4: memref<4x1xf32, #tpu.memory_space<vmem>>, %arg5: memref<8x20xf32, #tpu.memory_space<vmem>>, %arg6: memref<8x1xf32, #tpu.memory_space<vmem>>, %arg7: memref<8x8xf32, #tpu.memory_space<vmem>>, %arg8: memref<8x1xf32, #tpu.memory_space<vmem>>, %arg9: memref<1x8x16xf32, #tpu.memory_space<vmem>>, %arg10: memref<8x146xf32, #tpu.memory_space<vmem>>, %arg11: memref<40x16xf32, #tpu.memory_space<vmem>>, %arg12: memref<4x146xf32, #tpu.memory_space<vmem>>, %arg13: memref<20x16xf32, #tpu.memory_space<vmem>>) attributes {dimension_semantics = [#tpu.dimension_semantics<parallel>], iteration_bounds = array<i64: 2>, scalar_prefetch = 0 : i64, scratch_operands = 4 : i64, tpu.core_type = #tpu.core_type<tc>, window_params = [{transform_indices = @transform_0, window_bounds = array<i64: 1, 4, 16>}, {transform_indices = @transform_1, window_bounds = array<i64: 1, 4, 16>}, {pipeline_mode = #tpu.pipeline_mode<synchronous>, transform_indices = @transform_2, window_bounds = array<i64: 4, 40>}, {pipeline_mode = #tpu.pipeline_mode<synchronous>, transform_indices = @transform_3, window_bounds = array<i64: 4, 1>}, {pipeline_mode = #tpu.pipeline_mode<synchronous>, transform_indices = @transform_4, window_bounds = array<i64: 8, 20>}, {pipeline_mode = #tpu.pipeline_mode<synchronous>, transform_indices = @transform_5, window_bounds = array<i64: 8, 1>}, {pipeline_mode = #tpu.pipeline_mode<synchronous>, transform_indices = @transform_6, window_bounds = array<i64: 8, 8>}, {pipeline_mode = #tpu.pipeline_mode<synchronous>, transform_indices = @transform_7, window_bounds = array<i64: 8, 1>}, {transform_indices = @transform_8, window_bounds = array<i64: 1, 8, 16>}]} {
    %cst = arith.constant 0.000000e+00 : f32
    %0 = vector.broadcast %cst : f32 to vector<8x2xf32>
    %c0 = arith.constant 0 : index
    %c126 = arith.constant 126 : index
    %1 = vector.load %arg10[%c0, %c126] : memref<8x146xf32, #tpu.memory_space<vmem>>, vector<8x2xf32>
    tpu.vector_store %arg10[%c0, %c126], %0 {strides = array<i32>} : memref<8x146xf32, #tpu.memory_space<vmem>>, vector<8x2xf32>,
    %cst_0 = arith.constant 0.000000e+00 : f32
    %2 = vector.broadcast %cst_0 : f32 to vector<8x2xf32>
    %c0_1 = arith.constant 0 : index
    %c144 = arith.constant 144 : index
    %3 = vector.load %arg10[%c0_1, %c144] : memref<8x146xf32, #tpu.memory_space<vmem>>, vector<8x2xf32>
    tpu.vector_store %arg10[%c0_1, %c144], %2 {strides = array<i32>} : memref<8x146xf32, #tpu.memory_space<vmem>>, vector<8x2xf32>,
    %c0_2 = arith.constant 0 : index
    %c0_3 = arith.constant 0 : index
    %c0_4 = arith.constant 0 : index
    %4 = vector.load %arg1[%c0_2, %c0_3, %c0_4] : memref<1x4x16xf32, #tpu.memory_space<vmem>>, vector<1x4x16xf32>
    %5 = vector.shape_cast %4 : vector<1x4x16xf32> to vector<4x16xf32>
    %c0_5 = arith.constant 0 : index
    %c128 = arith.constant 128 : index
    %6 = vector.load %arg10[%c0_5, %c128] : memref<8x146xf32, #tpu.memory_space<vmem>>, vector<4x16xf32>
    tpu.vector_store %arg10[%c0_5, %c128], %5 {strides = array<i32>} : memref<8x146xf32, #tpu.memory_space<vmem>>, vector<4x16xf32>,
    %c0_6 = arith.constant 0 : index
    %c0_7 = arith.constant 0 : index
    %c0_8 = arith.constant 0 : index
    %7 = vector.load %arg2[%c0_6, %c0_7, %c0_8] : memref<1x4x16xf32, #tpu.memory_space<vmem>>, vector<1x4x16xf32>
    %8 = vector.shape_cast %7 : vector<1x4x16xf32> to vector<4x16xf32>
    %c4 = arith.constant 4 : index
    %c128_9 = arith.constant 128 : index
    %9 = vector.load %arg10[%c4, %c128_9] : memref<8x146xf32, #tpu.memory_space<vmem>>, vector<4x16xf32>
    tpu.vector_store %arg10[%c4, %c128_9], %8 {strides = array<i32>} : memref<8x146xf32, #tpu.memory_space<vmem>>, vector<4x16xf32>,
    %c0_10 = arith.constant 0 : index
    %c126_11 = arith.constant 126 : index
    %10 = vector.load %arg10[%c0_10, %c126_11] : memref<8x146xf32, #tpu.memory_space<vmem>>, vector<8x16xf32>
    %c0_12 = arith.constant 0 : index
    %c0_13 = arith.constant 0 : index
    %11 = vector.load %arg11[%c0_12, %c0_13] : memref<40x16xf32, #tpu.memory_space<vmem>>, vector<8x16xf32>
    tpu.vector_store %arg11[%c0_12, %c0_13], %10 {strides = array<i32>} : memref<40x16xf32, #tpu.memory_space<vmem>>, vector<8x16xf32>,
    %c0_14 = arith.constant 0 : index
    %c127 = arith.constant 127 : index
    %12 = vector.load %arg10[%c0_14, %c127] : memref<8x146xf32, #tpu.memory_space<vmem>>, vector<8x16xf32>
    %c8 = arith.constant 8 : index
    %c0_15 = arith.constant 0 : index
    %13 = vector.load %arg11[%c8, %c0_15] : memref<40x16xf32, #tpu.memory_space<vmem>>, vector<8x16xf32>
    tpu.vector_store %arg11[%c8, %c0_15], %12 {strides = array<i32>} : memref<40x16xf32, #tpu.memory_space<vmem>>, vector<8x16xf32>,
    %c0_16 = arith.constant 0 : index
    %c128_17 = arith.constant 128 : index
    %14 = vector.load %arg10[%c0_16, %c128_17] : memref<8x146xf32, #tpu.memory_space<vmem>>, vector<8x16xf32>
    %c16 = arith.constant 16 : index
    %c0_18 = arith.constant 0 : index
    %15 = vector.load %arg11[%c16, %c0_18] : memref<40x16xf32, #tpu.memory_space<vmem>>, vector<8x16xf32>
    tpu.vector_store %arg11[%c16, %c0_18], %14 {strides = array<i32>} : memref<40x16xf32, #tpu.memory_space<vmem>>, vector<8x16xf32>,
    %c0_19 = arith.constant 0 : index
    %c129 = arith.constant 129 : index
    %16 = vector.load %arg10[%c0_19, %c129] : memref<8x146xf32, #tpu.memory_space<vmem>>, vector<8x16xf32>
    %c24 = arith.constant 24 : index
    %c0_20 = arith.constant 0 : index
    %17 = vector.load %arg11[%c24, %c0_20] : memref<40x16xf32, #tpu.memory_space<vmem>>, vector<8x16xf32>
    tpu.vector_store %arg11[%c24, %c0_20], %16 {strides = array<i32>} : memref<40x16xf32, #tpu.memory_space<vmem>>, vector<8x16xf32>,
    %c0_21 = arith.constant 0 : index
    %c130 = arith.constant 130 : index
    %18 = vector.load %arg10[%c0_21, %c130] : memref<8x146xf32, #tpu.memory_space<vmem>>, vector<8x16xf32>
    %c32 = arith.constant 32 : index
    %c0_22 = arith.constant 0 : index
    %19 = vector.load %arg11[%c32, %c0_22] : memref<40x16xf32, #tpu.memory_space<vmem>>, vector<8x16xf32>
    tpu.vector_store %arg11[%c32, %c0_22], %18 {strides = array<i32>} : memref<40x16xf32, #tpu.memory_space<vmem>>, vector<8x16xf32>,
    %c0_23 = arith.constant 0 : index
    %c0_24 = arith.constant 0 : index
    %20 = vector.load %arg3[%c0_23, %c0_24] : memref<4x40xf32, #tpu.memory_space<vmem>>, vector<4x40xf32>
    %c0_25 = arith.constant 0 : index
    %c0_26 = arith.constant 0 : index
    %21 = vector.load %arg11[%c0_25, %c0_26] : memref<40x16xf32, #tpu.memory_space<vmem>>, vector<40x16xf32>
    %cst_27 = arith.constant dense<0.000000e+00> : vector<4x16xf32>
    %22 = tpu.matmul %20, %21, %cst_27 {dimension_numbers = #tpu.dot_dimension_numbers<[1], [0], [0], [1], [0, 0, 1, 1], [], []>} : vector<4x40xf32>, vector<40x16xf32>, vector<4x16xf32> -> vector<4x16xf32>
    %c0_28 = arith.constant 0 : index
    %c0_29 = arith.constant 0 : index
    %23 = vector.load %arg4[%c0_28, %c0_29] : memref<4x1xf32, #tpu.memory_space<vmem>>, vector<4x1xf32>
    %24 = vector.broadcast %23 : vector<4x1xf32> to vector<4x16xf32>
    %25 = arith.addf %22, %24 : vector<4x16xf32>
    %cst_30 = arith.constant dense<0.000000e+00> : vector<4xf32>
    %26 = vector.multi_reduction <add>, %25, %cst_30 [1] : vector<4x16xf32> to vector<4xf32>
    %27 = vector.shape_cast %26 : vector<4xf32> to vector<4x1xf32>
    %cst_31 = arith.constant 1.600000e+01 : f32
    %28 = vector.broadcast %cst_31 : f32 to vector<4x1xf32>
    %29 = arith.divf %27, %28 : vector<4x1xf32>
    %30 = vector.broadcast %29 : vector<4x1xf32> to vector<4x16xf32>
    %31 = arith.subf %25, %30 : vector<4x16xf32>
    %32 = arith.mulf %31, %31 : vector<4x16xf32>
    %cst_32 = arith.constant dense<0.000000e+00> : vector<4xf32>
    %33 = vector.multi_reduction <add>, %32, %cst_32 [1] : vector<4x16xf32> to vector<4xf32>
    %34 = vector.shape_cast %33 : vector<4xf32> to vector<4x1xf32>
    %cst_33 = arith.constant 1.600000e+01 : f32
    %35 = vector.broadcast %cst_33 : f32 to vector<4x1xf32>
    %36 = arith.divf %34, %35 : vector<4x1xf32>
    %37 = vector.broadcast %29 : vector<4x1xf32> to vector<4x16xf32>
    %38 = arith.subf %25, %37 : vector<4x16xf32>
    %cst_34 = arith.constant 9.99999974E-6 : f32
    %39 = vector.broadcast %cst_34 : f32 to vector<4x1xf32>
    %40 = arith.addf %36, %39 : vector<4x1xf32>
    %41 = math.rsqrt %40 : vector<4x1xf32>
    %42 = vector.broadcast %41 : vector<4x1xf32> to vector<4x16xf32>
    %43 = arith.mulf %38, %42 : vector<4x16xf32>
    %cst_35 = arith.constant 0.000000e+00 : f32
    %44 = vector.broadcast %cst_35 : f32 to vector<4x16xf32>
    %45 = arith.cmpf ogt, %43, %44 : vector<4x16xf32>
    %cst_36 = arith.constant 2.000000e-01 : f32
    %46 = vector.broadcast %cst_36 : f32 to vector<4x16xf32>
    %47 = arith.mulf %46, %43 : vector<4x16xf32>
    %48 = arith.select %45, %43, %47 : vector<4x16xi1>, vector<4x16xf32>
    %cst_37 = arith.constant 0.000000e+00 : f32
    %49 = vector.broadcast %cst_37 : f32 to vector<4x2xf32>
    %c0_38 = arith.constant 0 : index
    %c126_39 = arith.constant 126 : index
    %50 = vector.load %arg12[%c0_38, %c126_39] : memref<4x146xf32, #tpu.memory_space<vmem>>, vector<4x2xf32>
    tpu.vector_store %arg12[%c0_38, %c126_39], %49 {strides = array<i32>} : memref<4x146xf32, #tpu.memory_space<vmem>>, vector<4x2xf32>,
    %cst_40 = arith.constant 0.000000e+00 : f32
    %51 = vector.broadcast %cst_40 : f32 to vector<4x2xf32>
    %c0_41 = arith.constant 0 : index
    %c144_42 = arith.constant 144 : index
    %52 = vector.load %arg12[%c0_41, %c144_42] : memref<4x146xf32, #tpu.memory_space<vmem>>, vector<4x2xf32>
    tpu.vector_store %arg12[%c0_41, %c144_42], %51 {strides = array<i32>} : memref<4x146xf32, #tpu.memory_space<vmem>>, vector<4x2xf32>,
    %c0_43 = arith.constant 0 : index
    %c128_44 = arith.constant 128 : index
    %53 = vector.load %arg12[%c0_43, %c128_44] : memref<4x146xf32, #tpu.memory_space<vmem>>, vector<4x16xf32>
    tpu.vector_store %arg12[%c0_43, %c128_44], %48 {strides = array<i32>} : memref<4x146xf32, #tpu.memory_space<vmem>>, vector<4x16xf32>,
    %c0_45 = arith.constant 0 : index
    %c126_46 = arith.constant 126 : index
    %54 = vector.load %arg12[%c0_45, %c126_46] : memref<4x146xf32, #tpu.memory_space<vmem>>, vector<4x16xf32>
    %c0_47 = arith.constant 0 : index
    %c0_48 = arith.constant 0 : index
    %55 = vector.load %arg13[%c0_47, %c0_48] : memref<20x16xf32, #tpu.memory_space<vmem>>, vector<4x16xf32>
    tpu.vector_store %arg13[%c0_47, %c0_48], %54 {strides = array<i32>} : memref<20x16xf32, #tpu.memory_space<vmem>>, vector<4x16xf32>,
    %c0_49 = arith.constant 0 : index
    %c127_50 = arith.constant 127 : index
    %56 = vector.load %arg12[%c0_49, %c127_50] : memref<4x146xf32, #tpu.memory_space<vmem>>, vector<4x16xf32>
    %c4_51 = arith.constant 4 : index
    %c0_52 = arith.constant 0 : index
    %57 = vector.load %arg13[%c4_51, %c0_52] : memref<20x16xf32, #tpu.memory_space<vmem>>, vector<4x16xf32>
    tpu.vector_store %arg13[%c4_51, %c0_52], %56 {strides = array<i32>} : memref<20x16xf32, #tpu.memory_space<vmem>>, vector<4x16xf32>,
    %c0_53 = arith.constant 0 : index
    %c128_54 = arith.constant 128 : index
    %58 = vector.load %arg12[%c0_53, %c128_54] : memref<4x146xf32, #tpu.memory_space<vmem>>, vector<4x16xf32>
    %c8_55 = arith.constant 8 : index
    %c0_56 = arith.constant 0 : index
    %59 = vector.load %arg13[%c8_55, %c0_56] : memref<20x16xf32, #tpu.memory_space<vmem>>, vector<4x16xf32>
    tpu.vector_store %arg13[%c8_55, %c0_56], %58 {strides = array<i32>} : memref<20x16xf32, #tpu.memory_space<vmem>>, vector<4x16xf32>,
    %c0_57 = arith.constant 0 : index
    %c129_58 = arith.constant 129 : index
    %60 = vector.load %arg12[%c0_57, %c129_58] : memref<4x146xf32, #tpu.memory_space<vmem>>, vector<4x16xf32>
    %c12 = arith.constant 12 : index
    %c0_59 = arith.constant 0 : index
    %61 = vector.load %arg13[%c12, %c0_59] : memref<20x16xf32, #tpu.memory_space<vmem>>, vector<4x16xf32>
    tpu.vector_store %arg13[%c12, %c0_59], %60 {strides = array<i32>} : memref<20x16xf32, #tpu.memory_space<vmem>>, vector<4x16xf32>,
    %c0_60 = arith.constant 0 : index
    %c130_61 = arith.constant 130 : index
    %62 = vector.load %arg12[%c0_60, %c130_61] : memref<4x146xf32, #tpu.memory_space<vmem>>, vector<4x16xf32>
    %c16_62 = arith.constant 16 : index
    %c0_63 = arith.constant 0 : index
    %63 = vector.load %arg13[%c16_62, %c0_63] : memref<20x16xf32, #tpu.memory_space<vmem>>, vector<4x16xf32>
    tpu.vector_store %arg13[%c16_62, %c0_63], %62 {strides = array<i32>} : memref<20x16xf32, #tpu.memory_space<vmem>>, vector<4x16xf32>,
    %c0_64 = arith.constant 0 : index
    %c0_65 = arith.constant 0 : index
    %64 = vector.load %arg5[%c0_64, %c0_65] : memref<8x20xf32, #tpu.memory_space<vmem>>, vector<8x20xf32>
    %c0_66 = arith.constant 0 : index
    %c0_67 = arith.constant 0 : index
    %65 = vector.load %arg13[%c0_66, %c0_67] : memref<20x16xf32, #tpu.memory_space<vmem>>, vector<20x16xf32>
    %cst_68 = arith.constant dense<0.000000e+00> : vector<8x16xf32>
    %66 = tpu.matmul %64, %65, %cst_68 {dimension_numbers = #tpu.dot_dimension_numbers<[1], [0], [0], [1], [0, 0, 1, 1], [], []>} : vector<8x20xf32>, vector<20x16xf32>, vector<8x16xf32> -> vector<8x16xf32>
    %c0_69 = arith.constant 0 : index
    %c0_70 = arith.constant 0 : index
    %67 = vector.load %arg6[%c0_69, %c0_70] : memref<8x1xf32, #tpu.memory_space<vmem>>, vector<8x1xf32>
    %68 = vector.broadcast %67 : vector<8x1xf32> to vector<8x16xf32>
    %69 = arith.addf %66, %68 : vector<8x16xf32>
    %cst_71 = arith.constant dense<0.000000e+00> : vector<8xf32>
    %70 = vector.multi_reduction <add>, %69, %cst_71 [1] : vector<8x16xf32> to vector<8xf32>
    %71 = vector.shape_cast %70 : vector<8xf32> to vector<8x1xf32>
    %cst_72 = arith.constant 1.600000e+01 : f32
    %72 = vector.broadcast %cst_72 : f32 to vector<8x1xf32>
    %73 = arith.divf %71, %72 : vector<8x1xf32>
    %74 = vector.broadcast %73 : vector<8x1xf32> to vector<8x16xf32>
    %75 = arith.subf %69, %74 : vector<8x16xf32>
    %76 = arith.mulf %75, %75 : vector<8x16xf32>
    %cst_73 = arith.constant dense<0.000000e+00> : vector<8xf32>
    %77 = vector.multi_reduction <add>, %76, %cst_73 [1] : vector<8x16xf32> to vector<8xf32>
    %78 = vector.shape_cast %77 : vector<8xf32> to vector<8x1xf32>
    %cst_74 = arith.constant 1.600000e+01 : f32
    %79 = vector.broadcast %cst_74 : f32 to vector<8x1xf32>
    %80 = arith.divf %78, %79 : vector<8x1xf32>
    %81 = vector.broadcast %73 : vector<8x1xf32> to vector<8x16xf32>
    %82 = arith.subf %69, %81 : vector<8x16xf32>
    %cst_75 = arith.constant 9.99999974E-6 : f32
    %83 = vector.broadcast %cst_75 : f32 to vector<8x1xf32>
    %84 = arith.addf %80, %83 : vector<8x1xf32>
    %85 = math.rsqrt %84 : vector<8x1xf32>
    %86 = vector.broadcast %85 : vector<8x1xf32> to vector<8x16xf32>
    %87 = arith.mulf %82, %86 : vector<8x16xf32>
    %c0_76 = arith.constant 0 : index
    %c0_77 = arith.constant 0 : index
    %88 = vector.load %arg7[%c0_76, %c0_77] : memref<8x8xf32, #tpu.memory_space<vmem>>, vector<8x8xf32>
    %c0_78 = arith.constant 0 : index
    %c128_79 = arith.constant 128 : index
    %89 = vector.load %arg10[%c0_78, %c128_79] : memref<8x146xf32, #tpu.memory_space<vmem>>, vector<8x16xf32>
    %cst_80 = arith.constant dense<0.000000e+00> : vector<8x16xf32>
    %90 = tpu.matmul %88, %89, %cst_80 {dimension_numbers = #tpu.dot_dimension_numbers<[1], [0], [0], [1], [0, 0, 1, 1], [], []>} : vector<8x8xf32>, vector<8x16xf32>, vector<8x16xf32> -> vector<8x16xf32>
    %c0_81 = arith.constant 0 : index
    %c0_82 = arith.constant 0 : index
    %91 = vector.load %arg8[%c0_81, %c0_82] : memref<8x1xf32, #tpu.memory_space<vmem>>, vector<8x1xf32>
    %92 = vector.broadcast %91 : vector<8x1xf32> to vector<8x16xf32>
    %93 = arith.addf %90, %92 : vector<8x16xf32>
    %94 = arith.addf %87, %93 : vector<8x16xf32>
    %cst_83 = arith.constant 0.000000e+00 : f32
    %95 = vector.broadcast %cst_83 : f32 to vector<8x16xf32>
    %96 = arith.cmpf ogt, %94, %95 : vector<8x16xf32>
    %cst_84 = arith.constant 2.000000e-01 : f32
    %97 = vector.broadcast %cst_84 : f32 to vector<8x16xf32>
    %98 = arith.mulf %97, %94 : vector<8x16xf32>
    %99 = arith.select %96, %94, %98 : vector<8x16xi1>, vector<8x16xf32>
    %c0_85 = arith.constant 0 : index
    %c0_86 = arith.constant 0 : index
    %c0_87 = arith.constant 0 : index
    %100 = vector.load %arg9[%c0_85, %c0_86, %c0_87] : memref<1x8x16xf32, #tpu.memory_space<vmem>>, vector<1x8x16xf32>
    %101 = vector.shape_cast %100 : vector<1x8x16xf32> to vector<8x16xf32>
    %102 = vector.shape_cast %99 : vector<8x16xf32> to vector<1x8x16xf32>
    tpu.vector_store %arg9[%c0_85, %c0_86, %c0_87], %102 {strides = array<i32>} : memref<1x8x16xf32, #tpu.memory_space<vmem>>, vector<1x8x16xf32>,
    return
  }
  func.func @transform_0(%arg0: i32) -> (i32, i32, i32) {
    %c0_i32 = arith.constant 0 : i32
    %c0_i32_0 = arith.constant 0 : i32
    %c0_i32_1 = arith.constant 0 : i32
    return %arg0, %c0_i32, %c0_i32_0 : i32, i32, i32
  }
  func.func @transform_1(%arg0: i32) -> (i32, i32, i32) {
    %c0_i32 = arith.constant 0 : i32
    %c0_i32_0 = arith.constant 0 : i32
    %c0_i32_1 = arith.constant 0 : i32
    return %arg0, %c0_i32, %c0_i32_0 : i32, i32, i32
  }
  func.func @transform_2(%arg0: i32) -> (i32, i32) {
    %c0_i32 = arith.constant 0 : i32
    %c0_i32_0 = arith.constant 0 : i32
    %c0_i32_1 = arith.constant 0 : i32
    return %c0_i32, %c0_i32_0 : i32, i32
  }
  func.func @transform_3(%arg0: i32) -> (i32, i32) {
    %c0_i32 = arith.constant 0 : i32
    %c0_i32_0 = arith.constant 0 : i32
    %c0_i32_1 = arith.constant 0 : i32
    return %c0_i32, %c0_i32_0 : i32, i32
  }
  func.func @transform_4(%arg0: i32) -> (i32, i32) {
    %c0_i32 = arith.constant 0 : i32
    %c0_i32_0 = arith.constant 0 : i32
    %c0_i32_1 = arith.constant 0 : i32
    return %c0_i32, %c0_i32_0 : i32, i32
  }
  func.func @transform_5(%arg0: i32) -> (i32, i32) {
    %c0_i32 = arith.constant 0 : i32
    %c0_i32_0 = arith.constant 0 : i32
    %c0_i32_1 = arith.constant 0 : i32
    return %c0_i32, %c0_i32_0 : i32, i32
  }
  func.func @transform_6(%arg0: i32) -> (i32, i32) {
    %c0_i32 = arith.constant 0 : i32
    %c0_i32_0 = arith.constant 0 : i32
    %c0_i32_1 = arith.constant 0 : i32
    return %c0_i32, %c0_i32_0 : i32, i32
  }
  func.func @transform_7(%arg0: i32) -> (i32, i32) {
    %c0_i32 = arith.constant 0 : i32
    %c0_i32_0 = arith.constant 0 : i32
    %c0_i32_1 = arith.constant 0 : i32
    return %c0_i32, %c0_i32_0 : i32, i32
  }
  func.func @transform_8(%arg0: i32) -> (i32, i32, i32) {
    %c0_i32 = arith.constant 0 : i32
    %c0_i32_0 = arith.constant 0 : i32
    %c0_i32_1 = arith.constant 0 : i32
    return %arg0, %c0_i32, %c0_i32_0 : i32, i32, i32
  }
}

</mosaic_0001>

<bundles_post_ra>
// kernel: residual_up_block.1
= control target key start
LH: loop header
LB: loop body
LE: loop exit
PB: predicated region body
PF: predicated region fallthrough
CT: control target
= control target key end

     0   :  { %13 = vsyncpa [#allocation7], 0  ;;  %s1003_s0 = inlined_call_operand.vmem [shape: f32[2,4,16], index: 0, kind: input, shape index: {}]   ;;  %s1004_s1 = inlined_call_operand.vmem [shape: f32[2,4,16], index: 1, kind: input, shape index: {}]   ;;  %s1005_s2 = inlined_call_operand.vmem [shape: f32[4,40], index: 2, kind: input, shape index: {}]   ;;  %s1006_s3 = inlined_call_operand.vmem [shape: f32[4,1], index: 3, kind: input, shape index: {}]   ;;  %s1007_s4 = inlined_call_operand.vmem [shape: f32[8,20], index: 4, kind: input, shape index: {}]   ;;  %s1008_s5 = inlined_call_operand.vmem [shape: f32[8,1], index: 5, kind: input, shape index: {}]   ;;  %s1009_s6 = inlined_call_operand.vmem [shape: f32[8,8], index: 6, kind: input, shape index: {}]   ;;  %s1010_s7 = inlined_call_operand.vmem [shape: f32[8,1], index: 7, kind: input, shape index: {}]   ;;  %s1011_s8 = inlined_call_operand.hbm [shape: f32[2,8,16], index: 8, kind: output, shape index: {}]  }
   0x1   :  { %15 = vsyncpa [#allocation7 + $0x1], 0  ;;  %s854_s27 = smov 0   ;;  %s856_s28 = smov 0  }
   0x2   :  { %s858_s29 = smov 0   ;;  %s860_s30 = smov 0  }
   0x3 LB: > { %s875_s9 = sadd.s32 4294967295, %s800_s30   ;;  %s669_s10 = sadd.s32 4294967294, %s800_s30   ;;  %s800_s30 = sphi %s860_s30, %s1017_s30   ;;  %s796_s29 = sphi %s858_s29, %s1016_s29   ;;  %s792_s28 = sphi %s856_s28, %s1015_s28   ;;  %s788_s27 = sphi %s854_s27, %s1014_s27  }
   0x4   : > { %s879_s11 = sadd.s32 1, %s800_s30   ;;  %s206_s12 = sadd.s32 1, %s796_s29 }
   0x5   : > { %s203_s13 = ssub.s32 %s800_s30, %s879_s11  ;;  %p216_p0 = scmp.ne.s32.totalorder %s796_s29, %s792_s28 }
   0x6   : > { %p204_p1 = scmp.eq.s32.totalorder %s203_s13, 0  ;;  %p217_p2 = scmp.eq.s32.totalorder %s875_s9, 1 }
   0x7   : > { %p222_p3 = scmp.ne.s32.totalorder %s792_s28, %s788_s27  ;;  %p223_p4 = scmp.eq.s32.totalorder %s669_s10, 1 }
   0x8   : > { %s890_s14 = scalar_select %p204_p1, %s796_s29, %s206_s12  }
   0x9   : > { %p892_p5 = por %p217_p2, %p216_p0  ;;  %p896_p6 = por %p223_p4, %p222_p3 }
   0xa   : > { %p672_p7 = scmp.ge.s32.totalorder %s800_s30, 1  ;;  %p273_p8 = scmp.lt.s32.totalorder %s800_s30, 3 }
   0xc   : > { %p274_p9 = pnand %p672_p7, %p273_p8 }
   0xd   : > { %p310_p10 = scmp.lt.s32.totalorder (!%p274_p9), %s875_s9, 1  ;;  %s803_s25 = smov (!%p274_p9), 1  }
   0xe   : > { %277 = sbr.rel (%p274_p9) target bundleno = 1141 (0x475), region = 52  ;;  %s804_s26 = smov (!%p274_p9), 2  }
   0xf   : > { %s805_s10 = smov (!%p274_p9), 126   ;;  %s806_s12 = smov (!%p274_p9), 127  }
  0x13   : > { %vm318_vm0 = vcmask 1048560   ;;  %vm438_vm1 = vcmask 1044464   ;;  %vm320_vm2 = vcmask 146560   ;;  %v802_v0 = vmov 0.0   ;;  %s311_s17 = scalar_select %p310_p10, %s875_s9, 1  ;;  %v489_v61 = vld [vmem:[%s1008_s5] sm:$0xff] }
  0x14   : > { %319 = vst.msk [vmem:[#allocation2] sm:$0xff] %vm318_vm0, %v802_v0  ;;  %vm323_vm3 = vcmask 125952   ;;  %vm329_vm4 = vcmask 130052   ;;  %vm342_vm5 = vcmask 130048   ;;  %vm339_vm6 = vcmask 15360  }
  0x15   : > { %439 = vst.msk [vmem:[#allocation4] sm:$0xf] %vm438_vm1, %v802_v0  ;;  %s674_s18 = sshll.u32 %s311_s17, 2  ;;  %v376_v10 = vld [vmem:[%s1006_s3] sm:$0xf]  ;;  %v807_v11 = vmov 0  }
  0x16   : > { %321 = vst.msk [vmem:[#allocation2 + $0x8] sm:$0xff] %vm320_vm2, %v802_v0  ;;  %s313_s21 = scalar_lea.vmem %s1003_s0, %s674_s18  ;;  %s317_s24 = scalar_lea.vmem %s1004_s1, %s674_s18  ;;  %730 = vset.pattern.permute.xlu0 %v807_v11  ;;  %731 = vset.pattern.permute.xlu1 %v807_v11  ;;  %vm352_vm7 = vcmask 7168   ;;  %v370_v20 = vld [vmem:[%s1005_s2] sm:$0xf]  ;;  %vm382_vm8 = vcmask 326656   ;;  %v808_v26 = vmov 16.0  }
  0x17   : > { %v322_v1 = vld [vmem:[%s313_s21] sm:$0xf]  ;;  %732 = vrcp.f32 %v808_v26  ;;  %vm440_vm9 = vcmask 142464   ;;  %vm499_vm15 = vcmask 1043456   ;;  %vm495_vm0 = vcmask 162816   ;;  %s681_s17 = sshll.u32 %s875_s9, 3 }
  0x18   : > { %v325_v2 = vld [vmem:[%s317_s24] sm:$0xf]  ;;  %324 = vst.msk [vmem:[#allocation2 + $0x8] sm:$0xf] %vm323_vm3, %v322_v1  ;;  %vm553_vm1 = vcmask 64512   ;;  %s593_s20 = scalar_lea.hbm %s1011_s8, %s681_s17 }
  0x19   : > { %v327_v3 = vrot.slane %v325_v2, 4  ;;  %441 = vst.msk [vmem:[#allocation4 + $0x4] sm:$0xf] %vm440_vm9, %v802_v0  ;;  %s597_s23 = sshll.u32 %s593_s20, 4  ;;  %s598_s23 = int_to_ptr.hbm [resolvable:$true] %s597_s23 }
  0x1a   : > { %s752_s24 = sshra.s32 %s598_s23, 4  ;;  %s753_s24 = int_to_ptr.hbm [resolvable:$true] %s752_s24 }
  0x1b   : > { %v344_v4 = vld [vmem:[#allocation2] sm:$0xff]  ;;  %330 = vst.msk [vmem:[#allocation2 + $0x8] sm:$0xf0] %vm329_vm4, %v327_v3  ;;  %p759_p0 = scmp.lt.s32.totalorder %s753_s24, %s1011_s8 }
  0x1c   : > { %348 = vrot.lane.b32.xlu1 %v344_v4, %s803_s25  ;;  %335 = vrot.lane.b32.xlu2 %v344_v4, %s804_s26 }
  0x1d   : > { %v733_v27 = vpop.eup %732 }
  0x1e   : > { %v410_v28 = vmul.f32 16.0, %v733_v27  ;;  %vm414_vm10 = vweird.f32 %v733_v27 }
  0x20   : > { %v411_v29 = vsub.f32 1.0, %v410_v28 }
  0x22   : > { %v364_v5 = vld [vmem:[#allocation2 + $0x8] sm:$0xff]  ;;  %v412_v30 = vmul.f32 %v733_v27, %v411_v29 }
  0x23   : > { %366 = vrot.lane.b32.xlu0 %v364_v5, %s805_s10  ;;  %572 = vmatpush.msra.mxu2 %v364_v5  ;;  %357 = vst.msk [vmem:[#allocation3 + $0x10] sm:$0xff] %vm342_vm5, %v364_v5 }
  0x24   : > { %350 = vrot.lane.b32.xlu1 %v364_v5, %s803_s25  ;;  %337 = vrot.lane.b32.xlu2 %v364_v5, %s804_s26  ;;  %v413_v31 = vadd.f32 %v733_v27, %v412_v30 }
  0x26   : > { %v935_v32 = vsel %vm414_vm10, %v733_v27, %v413_v31 }
  0x2a   : > { %v373_v18 = vld [vmem:[#allocation3 + $0x10] sm:$0xff] }
  0x2b   : > { %360 = vrot.lane.b32.xlu0 %v364_v5, %s806_s12 }
  0x33   : > { %379 = vperm.xlu0 %730, %v376_v10  }
  0x76   : > { %v336_v6 = vpop.permute.xlu2 %335 }
  0x7e   : > { %v338_v7 = vpop.permute.xlu2 %337 }
  0x7f   : > { %v340_v8 = vsel %vm339_vm6, %v336_v6, %v338_v7 }
  0x80   : > { %343 = vst.msk [vmem:[#allocation3] sm:$0xff] %vm342_vm5, %v340_v8  ;;  %v485_v8 = vld [vmem:[%s1007_s4] sm:$0xff] }
  0x87   : > { %v371_v21 = vld [vmem:[#allocation3] sm:$0xff] }
  0x8e   : > { %v349_v9 = vpop.permute.xlu1 %348 }
  0x95   : > { %v367_v12 = vpop.permute.xlu0 %366 }
  0x96   : > { %v351_v13 = vpop.permute.xlu1 %350  ;;  %369 = vst.msk [vmem:[#allocation3 + $0x20] sm:$0xff] %vm342_vm5, %v367_v12 }
  0x97   : > { %v353_v14 = vsel %vm352_vm7, %v349_v9, %v351_v13 }
  0x98   : > { %355 = vst.msk [vmem:[#allocation3 + $0x8] sm:$0xff] %vm342_vm5, %v353_v14  ;;  %v545_v14 = vld [vmem:[%s1009_s6] sm:$0xff] }
  0x99   : > { %679 = vmatmul.msk.f32.vlgmr.msra.gmra.mxu2 %vm553_vm1, %v545_v14 }
  0x9d   : > { %v361_v15 = vpop.permute.xlu0 %360  ;;  %v375_v16 = vld [vmem:[#allocation3 + $0x20] sm:$0xff] }
  0x9e   : > { %363 = vst.msk [vmem:[#allocation3 + $0x18] sm:$0xff] %vm342_vm5, %v361_v15  ;;  %397 = vmatpush.msra.mxu0 %v375_v16  ;;  %v547_v15 = vld [vmem:[%s1010_s7] sm:$0xff] }
  0x9f   : > { %v372_v19 = vld [vmem:[#allocation3 + $0x8] sm:$0xff] }
  0xa5   : > { %v374_v17 = vld [vmem:[#allocation3 + $0x18] sm:$0xff]  ;;  %v380_v22 = vpop.permute.xlu0 %379 }
  0xa6   : > { %398 = vmatpush.msra.mxu0 %v374_v17 }
  0xa8   : > { %399 = vmatpush.msra.mxu0 %v373_v18 }
  0xaa   : > { %400 = vmatpush.msra.mxu0 %v372_v19 }
  0xac   : > { %401 = vmatpush.msra.mxu0 %v371_v21 }
  0xad   : > { %676 = vmatmul.msk.f32.vlgmr.msra.gmra.mxu0 %vm382_vm8, %v370_v20 }
 0x11c   : > { %v574_v29 = vpop.f32.mrf.mxu2 }
 0x12a   : > { %v403_v23 = vpop.f32.mrf.mxu0 }
 0x12b   : > { %v404_v24 = vadd.f32 %v403_v23, %v380_v22 }
 0x12d   : > { %v406_v25 = vsel %vm323_vm3, %v404_v24, 0.0 }
 0x12e   : > { %407 = vadd.xlane.f32.xlu1 %v406_v25 }
 0x1a1   : > { %v408_v33 = vpop.xlane.xlu1 %407 }
 0x1a2   : > { %v416_v34 = vmul.f32 %v935_v32, %v408_v33 }
 0x1a4   : > { %v417_v35 = vsub.f32 %v404_v24, %v416_v34 }
 0x1a6   : > { %v418_v36 = vmul.f32 %v417_v35, %v417_v35 }
 0x1a8   : > { %v419_v37 = vsel %vm323_vm3, %v418_v36, 0.0 }
 0x1a9   : > { %420 = vadd.xlane.f32.xlu2 %v419_v37 }
 0x21c   : > { %v421_v38 = vpop.xlane.xlu2 %420 }
 0x21d   : > { %v422_v39 = vmul.f32 %v421_v38, %v935_v32 }
 0x21f   : > { %v423_v40 = vadd.f32 1e-05, %v422_v39 }
 0x221   : > { %734 = vrsqrt.f32 %v423_v40  ;;  %vm430_vm12 = vweird.f32 %v423_v40 }
 0x227   : > { %v735_v41 = vpop.eup %734 }
 0x228   : > { %v425_v42 = vmul.f32 %v735_v41, %v423_v40  ;;  %vm431_vm11 = vweird.f32 %v735_v41 }
 0x229   : > { %vm432_vm13 = vmor %vm430_vm12, %vm431_vm11 }
 0x22a   : > { %v426_v43 = vmul.f32 %v735_v41, %v425_v42 }
 0x22c   : > { %v427_v44 = vmul.f32 0.5, %v426_v43 }
 0x22e   : > { %v428_v45 = vsub.f32 1.5, %v427_v44 }
 0x230   : > { %v429_v46 = vmul.f32 %v735_v41, %v428_v45 }
 0x232   : > { %v433_v47 = vsel %vm432_vm13, %v735_v41, %v429_v46 }
 0x233   : > { %v434_v48 = vmul.f32 %v433_v47, %v417_v35 }
 0x235   : > { %vm435_vm14 = vcmp.gt.f32.partialorder %v434_v48, 0.0  ;;  %v436_v49 = vmul.f32 0.2, %v434_v48 }
 0x237   : > { %v437_v50 = vsel %vm435_vm14, %v434_v48, %v436_v49 }
 0x238   : > { %442 = vst.msk [vmem:[#allocation4 + $0x4] sm:$0xf] %vm323_vm3, %v437_v50 }
 0x23f   : > { %v443_v51 = vld [vmem:[#allocation4] sm:$0xff] }
 0x240   : > { %445 = vst [vmem:[#allocation1] ss:$2 sm:$0xff] %v443_v51  ;;  %v467_v52 = vld [vmem:[#allocation4 + $0x4] sm:$0xf] }
 0x241   : > { %468 = vst.msk [vmem:[#allocation5 + $0x8] sm:$0xf] %vm323_vm3, %v467_v52  ;;  %v469_v55 = vld [vmem:[#allocation4 + $0x4] sm:$0xf] }
 0x242   : > { %v477_v59 = vld [vmem:[#allocation4 + $0x4] sm:$0xf] }
 0x247   : > { %v446_v53 = vld.sshfl [vmem:[#allocation1] sm:$0xff pattern:$0x75316420]  ;;  %v447_v54 = vld.sshfl [vmem:[#allocation1 + $0x8] sm:$0xff pattern:$0x75316420] }
 0x248   : > { %448 = vrot.lane.b32.xlu0 %v446_v53, %s804_s26  ;;  %457 = vst [vmem:[#allocation1] ss:$2 sm:$0xff] %v443_v51 }
 0x24f   : > { %v459_v56 = vld.sshfl [vmem:[#allocation1 + $0x8] sm:$0xff pattern:$0x75316420]  ;;  %v458_v57 = vld.sshfl [vmem:[#allocation1] sm:$0xff pattern:$0x75316420] }
 0x250   : > { %462 = vrot.lane.b32.xlu1 %v459_v56, %s803_s25  ;;  %460 = vrot.lane.b32.xlu2 %v458_v57, %s803_s25  ;;  %471 = vst [vmem:[#allocation1] ss:$2 sm:$0xff] %v469_v55  ;;  %s754_s25 = scalar_lea.hbm %s753_s24, 8 }
 0x251   : > { %p755_p11 = scmp.ne.s32.totalorder %s753_s24, %s754_s25 }
 0x253   : > { %p756_p12 = pnand %p755_p11, %p892_p5 }
 0x255   : > { %p757_p13 = pneg %p756_p12 }
 0x257   : > { %v472_v58 = vld.sshfl [vmem:[#allocation1] sm:$0xff pattern:$0x75316420] }
 0x258   : > { %473 = vrot.lane.b32.xlu0 %v472_v58, %s806_s12  ;;  %479 = vst [vmem:[#allocation1] ss:$2 sm:$0xff] %v477_v59  ;;  %550 = vperm.xlu1 %731, %v547_v15   ;;  %s307_s12 = sand.u32 1, %s792_s28  }
 0x259   : > { %s673_s13 = sshll.u32 %s307_s12, 3  ;;  %s583_s9 = scalar_lea.sflag [#allocation7], %s307_s12 }
 0x25a   : > { %s309_s21 = scalar_lea.vmem [#allocation6], %s673_s13  ;;  %s758_s13 = scalar_lea.hbm %s1011_s8, 16 }
 0x25b   : > { %s595_s22 = sshll.u32 %s309_s21, 4  ;;  %p760_p1 = scmp.lt.s32.totalorder %s758_s13, %s754_s25  ;;  %s596_s22 = int_to_ptr.vmem [resolvable:$true] %s595_s22 }
 0x25d   : > { %p761_p2 = por %p760_p1, %p759_p0 }
 0x25f   : > { %v480_v60 = vld.sshfl [vmem:[#allocation1] sm:$0xff pattern:$0x75316420]  ;;  %p762_p3 = pnand %p761_p2, %p757_p13 }
 0x260   : > { %481 = vrot.lane.b32.xlu0 %v480_v60, %s805_s10 }
 0x268   : > { %450 = vrot.lane.b32.xlu0 %v447_v54, %s804_s26 }
 0x270   : > { %492 = vperm.xlu0 %730, %v489_v61  }
 0x2aa   : > { %v461_v62 = vpop.permute.xlu2 %460 }
 0x2ba   : > { %v449_v63 = vpop.permute.xlu0 %448 }
 0x2c2   : > { %v463_v0 = vpop.permute.xlu1 %462 }
 0x2c3   : > { %v464_v1 = vsel %vm352_vm7, %v461_v62, %v463_v0 }
 0x2c4   : > { %466 = vst.msk [vmem:[#allocation5 + $0x4] sm:$0xf] %vm323_vm3, %v464_v1 }
 0x2ca   : > { %v474_v2 = vpop.permute.xlu0 %473  ;;  %v551_v30 = vpop.permute.xlu1 %550 }
 0x2cb   : > { %476 = vst.msk [vmem:[#allocation5 + $0xc] sm:$0xf] %vm323_vm3, %v474_v2  ;;  %v575_v33 = vadd.f32 %v574_v29, %v551_v30 }
 0x2d2   : > { %v482_v3 = vpop.permute.xlu0 %481  ;;  %v487_v7 = vld [vmem:[#allocation5 + $0x8] sm:$0xff] }
 0x2d3   : > { %484 = vst.msk [vmem:[#allocation5 + $0x10] sm:$0xf] %vm323_vm3, %v482_v3 }
 0x2da   : > { %v451_v4 = vpop.permute.xlu0 %450  ;;  %v488_v5 = vld [vmem:[#allocation5 + $0x10] sm:$0xf] }
 0x2db   : > { %v452_v6 = vsel %vm339_vm6, %v449_v63, %v451_v4  ;;  %677 = vmatpush.msk.msra.mxu1 %vm499_vm15, %v488_v5 }
 0x2dc   : > { %454 = vst.msk [vmem:[#allocation5] sm:$0xf] %vm323_vm3, %v452_v6 }
 0x2dd   : > { %517 = vmatpush.msra.mxu1 %v487_v7 }
 0x2e2   : > { %v493_v10 = vpop.permute.xlu0 %492 }
 0x2e3   : > { %v486_v9 = vld [vmem:[#allocation5] sm:$0xff] }
 0x2e4   : > { %518 = vmatpush.msra.mxu1 %v486_v9 }
 0x2e5   : > { %678 = vmatmul.msk.f32.vlgmr.msra.gmra.mxu1 %vm495_vm0, %v485_v8 }
 0x362   : > { %v520_v11 = vpop.f32.mrf.mxu1 }
 0x363   : > { %v521_v12 = vadd.f32 %v520_v11, %v493_v10 }
 0x365   : > { %v523_v13 = vsel %vm342_vm5, %v521_v12, 0.0 }
 0x366   : > { %524 = vadd.xlane.f32.xlu0 %v523_v13 }
 0x3d9   : > { %v525_v16 = vpop.xlane.xlu0 %524 }
 0x3da   : > { %v526_v17 = vmul.f32 %v525_v16, %v935_v32 }
 0x3dc   : > { %v527_v18 = vsub.f32 %v521_v12, %v526_v17 }
 0x3de   : > { %v528_v19 = vmul.f32 %v527_v18, %v527_v18 }
 0x3e0   : > { %v529_v20 = vsel %vm342_vm5, %v528_v19, 0.0 }
 0x3e1   : > { %530 = vadd.xlane.f32.xlu2 %v529_v20 }
 0x454   : > { %v531_v21 = vpop.xlane.xlu2 %530 }
 0x455   : > { %v532_v22 = vmul.f32 %v531_v21, %v935_v32 }
 0x457   : > { %v533_v23 = vadd.f32 1e-05, %v532_v22 }
 0x459   : > { %736 = vrsqrt.f32 %v533_v23  ;;  %vm540_vm3 = vweird.f32 %v533_v23 }
 0x45f   : > { %v737_v24 = vpop.eup %736 }
 0x460   : > { %v535_v25 = vmul.f32 %v737_v24, %v533_v23  ;;  %vm541_vm2 = vweird.f32 %v737_v24 }
 0x461   : > { %vm542_vm4 = vmor %vm540_vm3, %vm541_vm2 }
 0x462   : > { %v536_v26 = vmul.f32 %v737_v24, %v535_v25 }
 0x464   : > { %v537_v27 = vmul.f32 0.5, %v536_v26 }
 0x466   : > { %v538_v28 = vsub.f32 1.5, %v537_v27 }
 0x468   : > { %v539_v31 = vmul.f32 %v737_v24, %v538_v28 }
 0x46a   : > { %v543_v34 = vsel %vm542_vm4, %v737_v24, %v539_v31 }
 0x46b   : > { %v544_v32 = vmul.f32 %v543_v34, %v527_v18 }
 0x46d   : > { %v577_v35 = vadd.f32 %v575_v33, %v544_v32 }
 0x46f   : > { %vm578_vm6 = vcmp.gt.f32.partialorder %v577_v35, 0.0  ;;  %v579_v36 = vmul.f32 0.2, %v577_v35 }
 0x471   : > { %v580_v37 = vsel %vm578_vm6, %v577_v35, %v579_v36 }
 0x472   : > { %581 = vst.msk [vmem:[%s309_s21] sm:$0xff] %vm342_vm5, %v580_v37 }
 0x473   : > { %765 = shalt.err (!%p762_p3)
}
 0x474   : > { %684 = dma.vmem_to_hbm [thread:$0]  (%p892_p5), %s596_s22, 128, %s598_s23, %s583_s9  }
 0x475 PF: > { %p690_p4 = scmp.ge.s32.totalorder %s800_s30, 2  ;;  %s609_s12 = sand.u32 1, %s788_s27  }
 0x476   : > { %s610_s19 = scalar_lea.sflag [#allocation7], %s609_s12 }
 0x477   : > { %p687_p7 = pnand %p690_p4, %p896_p6 }
 0x479   : > { %p688_p8 = pneg %p687_p7 }
 0x47b   : > { %783 = dma.done.wait (%p688_p8), %s610_s19, 128  }
 0x47c   : > { %785 = vsyncadd (%p688_p8), %s610_s19, 4294967168  ;;  %p18_p9 = scmp.ge.s32.totalorder %s879_s11, 4   ;;  %s1014_s27 = smov %s792_s28 }
 0x47d   : > { %s1015_s28 = smov %s796_s29  ;;  %s1016_s29 = smov %s890_s14 }
 0x47e   : > { %s1017_s30 = smov %s879_s11  ;;  %20 = sbr.rel (!%p18_p9) target bundleno = 3 (0x3), region = 90 }
 0x483   :  { %616 = vsyncpa [#allocation7], 1 }
 0x484   :  { %618 = vsyncpa [#allocation7 + $0x1], 1 }

</bundles_post_ra>
